<compile_context>
chip_gen: v7x
topology: tpu7x:2x2x1
jax: 0.10.0
libtpu: 0.0.40
codegen_flags: <defaults>
</compile_context>

<pallas_src>
import numpy as np
import jax
import jax.numpy as jnp
from jax import lax
from jax.experimental import pallas as pl
from jax.experimental.pallas import tpu as pltpu

# ---- small, deterministic config consistent with TransformerLayer.__init__ ----
BATCH = 2
SEQ = 8
EMBED_DIM = 32
NUM_HEADS = 4
HEAD_DIM = EMBED_DIM // NUM_HEADS          # 8
HIDDEN_DIM = 64
GROUP_SIZE = SEQ                           # group_size >= seq -> full attention path
EPS = 1e-6


def _build_kernel(N, E, H, D, F):
    """Per-batch kernel (one grid step == one sequence), closed over static dims."""

    def kernel(x_ref, wqkv_ref, wo3_ref, w13_ref, w2_ref,
               ga_ref, gf_ref, rot_ref, o_ref):
        f32, bf16 = jnp.float32, jnp.bfloat16
        x = x_ref[0]                                             # (N, E) f32

        def rmsnorm(t, g):
            ms = jnp.mean(t * t, axis=-1, keepdims=True)
            return g * (t * lax.rsqrt(ms + EPS))

        def mm(a, w):                                            # bf16 MXU, f32 accumulate
            return jnp.dot(a.astype(bf16), w, preferred_element_type=f32)

        # ---------------- attention branch ----------------
        xn = rmsnorm(x, ga_ref[...])
        # Fused projection: [Wq@Pe*scale | Wq@Po*scale | Wk@Pe | Wk@Po | Wv]  -> (N, 5E)
        # Rotary cos/sin applied with ONE full-width multiply against the fused table.
        qkv = mm(xn, wqkv_ref[...]) * rot_ref[...]               # (N, 5E)
        q = qkv[:, 0 * E:1 * E] + qkv[:, 1 * E:2 * E]            # rotary done, scale folded
        k = qkv[:, 2 * E:3 * E] + qkv[:, 3 * E:4 * E]
        v = qkv[:, 4 * E:5 * E]

        def heads(t):                                            # (N, E) -> (H, N, D)
            return jnp.swapaxes(t.reshape(N, H, D), 0, 1)

        qh, kh, vh = heads(q), heads(k), heads(v)

        # Batched (leading batch dim = heads) contractions; no cross-batch work, no mask.
        s = jnp.einsum('hnd,hmd->hnm', qh.astype(bf16), kh.astype(bf16),
                       preferred_element_type=f32)               # (H, N, N)
        s = s - jnp.max(s, axis=-1, keepdims=True)
        p = jnp.exp(s)
        p = p * pl.reciprocal(jnp.sum(p, axis=-1, keepdims=True), approx=True)
        ctx = jnp.einsum('hnm,hmd->hnd', p.astype(bf16), vh.astype(bf16),
                         preferred_element_type=f32)             # (H, N, D)
        # Head concat folded into Wo: per-head (N,D)x(D,E) batched matmul, then head-sum.
        out_h = jnp.einsum('hnd,hde->hne', ctx.astype(bf16), wo3_ref[...],
                           preferred_element_type=f32)           # (H, N, E)
        x = x + jnp.sum(out_h, axis=0)

        # ---------------- feed-forward branch (SwiGLU) ----------------
        xn2 = rmsnorm(x, gf_ref[...])
        h13 = mm(xn2, w13_ref[...])                              # (N, 2F)  fused W1 | W3
        h1, h3 = h13[:, :F], h13[:, F:]
        hid = h1 * (h3 * jax.nn.sigmoid(h3))                     # x1 * silu(x3)
        x = x + mm(hid, w2_ref[...])

        o_ref[0] = x.astype(o_ref.dtype)

    return kernel


def _rotary_tables(N, H, D):
    """Host-side rotary helper tensors (NumPy)."""
    half = D // 2
    inv_freq = 1.0 / (10000.0 ** (np.arange(half, dtype=np.float32) / half))
    freqs = np.arange(N, dtype=np.float32)[:, None] * inv_freq[None, :]    # (N, D/2)
    cos, sin = np.cos(freqs), np.sin(freqs)
    a_head = np.concatenate([cos, sin], axis=-1)        # (N, D)  coeff of x_even
    b_head = np.concatenate([-sin, cos], axis=-1)       # (N, D)  coeff of x_odd
    ra = np.tile(a_head, (1, H))                        # (N, E)
    rb = np.tile(b_head, (1, H))

    pe_d = np.zeros((D, D), np.float32)
    po_d = np.zeros((D, D), np.float32)
    for j in range(half):
        pe_d[2 * j, j] = 1.0
        pe_d[2 * j, j + half] = 1.0
        po_d[2 * j + 1, j] = 1.0
        po_d[2 * j + 1, j + half] = 1.0
    pe = np.kron(np.eye(H, dtype=np.float32), pe_d)     # (E, E) even-element gather
    po = np.kron(np.eye(H, dtype=np.float32), po_d)     # (E, E) odd-element gather
    return ra, rb, pe, po


def transformer_layer(x, params, num_heads=NUM_HEADS, group_size=GROUP_SIZE):
    wq_t, wk_t, wv_t, wo_t, w1_t, w3_t, w2_t, ga, gf = params
    B, N, E = x.shape
    F = w1_t.shape[1]
    H = num_heads
    D = E // H
    # TODO(synk): grouped attention (group_size < seq) is not implemented.
    assert group_size >= N, "grouped-attention branch (group_size < seq) not implemented"
    scale = 1.0 / (D ** 0.5)
    bf16 = jnp.bfloat16

    ra, rb, pe, po = _rotary_tables(N, H, D)

    # Host-side folding: rotary gather matrices + score scale folded into the Q/K weights,
    # Q/K/V fused into one (E, 5E) weight; W1/W3 fused into (E, 2F); Wo reshaped per-head.
    wqkv = jnp.concatenate([wq_t @ pe * scale, wq_t @ po * scale,
                            wk_t @ pe, wk_t @ po, wv_t], axis=1).astype(bf16)   # (E, 5E)
    wo3 = wo_t.reshape(H, D, E).astype(bf16)                                    # (H, D, E)
    w13 = jnp.concatenate([w1_t, w3_t], axis=1).astype(bf16)                    # (E, 2F)
    w2_b = w2_t.astype(bf16)                                                    # (F, E)

    # Fused rotary table: [ra | rb | ra | rb | 1]  -> one full-width vmul in the kernel.
    rot = jnp.asarray(
        np.concatenate([ra, rb, ra, rb, np.ones((N, E), np.float32)], axis=1),
        jnp.float32)                                                            # (N, 5E)

    kernel = _build_kernel(N, E, H, D, F)

    out = pl.pallas_call(
        kernel,
        out_shape=jax.ShapeDtypeStruct((B, N, E), jnp.float32),
        grid=(B,),
        in_specs=[
            pl.BlockSpec((1, N, E), lambda b: (b, 0, 0)),      # x        (per-batch block)
            pl.BlockSpec((E, 5 * E), lambda b: (0, 0)),        # wqkv     (resident)
            pl.BlockSpec((H, D, E), lambda b: (0, 0, 0)),      # wo3      (resident)
            pl.BlockSpec((E, 2 * F), lambda b: (0, 0)),        # w13      (resident)
            pl.BlockSpec((F, E), lambda b: (0, 0)),            # w2       (resident)
            pl.BlockSpec((1, E), lambda b: (0, 0)),            # ga
            pl.BlockSpec((1, E), lambda b: (0, 0)),            # gf
            pl.BlockSpec((N, 5 * E), lambda b: (0, 0)),        # rotary table
        ],
        out_specs=pl.BlockSpec((1, N, E), lambda b: (b, 0, 0)),
        compiler_params=pltpu.CompilerParams(
            dimension_semantics=("parallel",),
            vmem_limit_bytes=32 * 1024 * 1024),
    )(x, wqkv, wo3, w13, w2_b, ga.reshape(1, E), gf.reshape(1, E), rot)
    return out


def reference(x, params, num_heads=NUM_HEADS):
    """Pure-JAX (f32) mirror of the PyTorch forward (full-attention branch)."""
    wq_t, wk_t, wv_t, wo_t, w1_t, w3_t, w2_t, ga, gf = params
    B, N, E = x.shape
    H = num_heads
    D = E // H

    def rmsnorm(t, g):
        t = t.astype(jnp.float32)
        ms = jnp.mean(jnp.square(t), axis=-1, keepdims=True)
        return g * (t * lax.rsqrt(ms + EPS))

    inv_freq = 1.0 / (10000.0 ** (jnp.arange(D // 2, dtype=jnp.float32) / (D // 2)))
    freqs = jnp.arange(N, dtype=jnp.float32)[:, None] * inv_freq[None, :]
    cos, sin = jnp.cos(freqs), jnp.sin(freqs)

    def rope(t):  # (B, H, N, D)
        t1, t2 = t[..., ::2], t[..., 1::2]
        c, s = cos[None, None], sin[None, None]
        return jnp.concatenate([t1 * c - t2 * s, t1 * s + t2 * c], axis=-1)

    xn = rmsnorm(x, ga)
    q = (xn @ wq_t).reshape(B, N, H, D).transpose(0, 2, 1, 3)
    k = (xn @ wk_t).reshape(B, N, H, D).transpose(0, 2, 1, 3)
    v = (xn @ wv_t).reshape(B, N, H, D).transpose(0, 2, 1, 3)
    q, k = rope(q), rope(k)
    scores = jnp.einsum('bhnd,bhmd->bhnm', q, k) / (D ** 0.5)
    probs = jax.nn.softmax(scores, axis=-1)
    attn = jnp.einsum('bhnm,bhmd->bhnd', probs, v)
    attn = attn.transpose(0, 2, 1, 3).reshape(B, N, E)
    x = x + attn @ wo_t

    xn2 = rmsnorm(x, gf)
    h1, h3 = xn2 @ w1_t, xn2 @ w3_t
    x = x + (h1 * (h3 * jax.nn.sigmoid(h3))) @ w2_t
    return x


if __name__ == "__main__":
    key = jax.random.PRNGKey(0)
    ks = jax.random.split(key, 10)
    E, F = EMBED_DIM, HIDDEN_DIM

    x = jax.random.normal(ks[0], (BATCH, SEQ, E), jnp.float32)

    # torch Linear stores (out, in); the wrapper consumes the transpose (in, out).
    def lin(k, out_dim, in_dim):
        return (jax.random.normal(k, (out_dim, in_dim), jnp.float32) * 0.08).T

    wq_t = lin(ks[1], E, E)
    wk_t = lin(ks[2], E, E)
    wv_t = lin(ks[3], E, E)
    wo_t = lin(ks[4], E, E)
    w1_t = lin(ks[5], F, E)
    w3_t = lin(ks[6], F, E)
    w2_t = lin(ks[7], E, F)
    ga = 1.0 + 0.05 * jax.random.normal(ks[8], (E,), jnp.float32)
    gf = 1.0 + 0.05 * jax.random.normal(ks[9], (E,), jnp.float32)
    params = (wq_t, wk_t, wv_t, wo_t, w1_t, w3_t, w2_t, ga, gf)

    out = transformer_layer(x, params)
    out = jax.block_until_ready(out)

    ref = reference(x, params)
    assert out.shape == (BATCH, SEQ, E)
    # bf16 matmul operands + approx reciprocal -> loosened tolerance vs. the f32 reference.
    np.testing.assert_allclose(np.asarray(out), np.asarray(ref), rtol=2e-2, atol=2e-2)
    print("KERNEL_OK")
</pallas_src>

<mosaic_0001>
module attributes {stable_mosaic.version = 11 : i64} {
  func.func @kernel(%arg0: i32, %arg1: memref<1x8x32xf32, #tpu.memory_space<vmem>>, %arg2: memref<32x160xbf16, #tpu.memory_space<vmem>>, %arg3: memref<4x8x32xbf16, #tpu.memory_space<vmem>>, %arg4: memref<32x128xbf16, #tpu.memory_space<vmem>>, %arg5: memref<64x32xbf16, #tpu.memory_space<vmem>>, %arg6: memref<1x32xf32, #tpu.memory_space<vmem>>, %arg7: memref<1x32xf32, #tpu.memory_space<vmem>>, %arg8: memref<8x160xf32, #tpu.memory_space<vmem>>, %arg9: memref<1x8x32xf32, #tpu.memory_space<vmem>>) attributes {dimension_semantics = [#tpu.dimension_semantics<parallel>], iteration_bounds = array<i64: 2>, scalar_prefetch = 0 : i64, scratch_operands = 0 : i64, tpu.core_type = #tpu.core_type<tc>, window_params = [{transform_indices = @transform_0, window_bounds = array<i64: 1, 8, 32>}, {pipeline_mode = #tpu.pipeline_mode<synchronous>, transform_indices = @transform_1, window_bounds = array<i64: 32, 160>}, {pipeline_mode = #tpu.pipeline_mode<synchronous>, transform_indices = @transform_2, window_bounds = array<i64: 4, 8, 32>}, {pipeline_mode = #tpu.pipeline_mode<synchronous>, transform_indices = @transform_3, window_bounds = array<i64: 32, 128>}, {pipeline_mode = #tpu.pipeline_mode<synchronous>, transform_indices = @transform_4, window_bounds = array<i64: 64, 32>}, {pipeline_mode = #tpu.pipeline_mode<synchronous>, transform_indices = @transform_5, window_bounds = array<i64: 1, 32>}, {pipeline_mode = #tpu.pipeline_mode<synchronous>, transform_indices = @transform_6, window_bounds = array<i64: 1, 32>}, {pipeline_mode = #tpu.pipeline_mode<synchronous>, transform_indices = @transform_7, window_bounds = array<i64: 8, 160>}, {transform_indices = @transform_8, window_bounds = array<i64: 1, 8, 32>}]} {
    %c0 = arith.constant 0 : index
    %c0_0 = arith.constant 0 : index
    %c0_1 = arith.constant 0 : index
    %0 = vector.load %arg1[%c0, %c0_0, %c0_1] : memref<1x8x32xf32, #tpu.memory_space<vmem>>, vector<1x8x32xf32>
    %1 = vector.shape_cast %0 : vector<1x8x32xf32> to vector<8x32xf32>
    %c0_2 = arith.constant 0 : index
    %c0_3 = arith.constant 0 : index
    %2 = vector.load %arg6[%c0_2, %c0_3] : memref<1x32xf32, #tpu.memory_space<vmem>>, vector<1x32xf32>
    %3 = arith.mulf %1, %1 : vector<8x32xf32>
    %cst = arith.constant dense<0.000000e+00> : vector<8xf32>
    %4 = vector.multi_reduction <add>, %3, %cst [1] : vector<8x32xf32> to vector<8xf32>
    %5 = vector.shape_cast %4 : vector<8xf32> to vector<8x1xf32>
    %cst_4 = arith.constant 3.200000e+01 : f32
    %6 = vector.broadcast %cst_4 : f32 to vector<8x1xf32>
    %7 = arith.divf %5, %6 : vector<8x1xf32>
    %cst_5 = arith.constant 9.99999997E-7 : f32
    %8 = vector.broadcast %cst_5 : f32 to vector<8x1xf32>
    %9 = arith.addf %7, %8 : vector<8x1xf32>
    %10 = math.rsqrt %9 : vector<8x1xf32>
    %11 = vector.broadcast %10 : vector<8x1xf32> to vector<8x32xf32>
    %12 = arith.mulf %1, %11 : vector<8x32xf32>
    %13 = vector.broadcast %2 : vector<1x32xf32> to vector<8x32xf32>
    %14 = arith.mulf %13, %12 : vector<8x32xf32>
    %c0_6 = arith.constant 0 : index
    %c0_7 = arith.constant 0 : index
    %15 = vector.load %arg2[%c0_6, %c0_7] : memref<32x160xbf16, #tpu.memory_space<vmem>>, vector<32x160xbf16>
    %16 = arith.truncf %14 : vector<8x32xf32> to vector<8x32xbf16>
    %cst_8 = arith.constant dense<0.000000e+00> : vector<8x160xf32>
    %17 = tpu.matmul %16, %15, %cst_8 {dimension_numbers = #tpu.dot_dimension_numbers<[1], [0], [0], [1], [0, 0, 1, 1], [], []>} : vector<8x32xbf16>, vector<32x160xbf16>, vector<8x160xf32> -> vector<8x160xf32>
    %c0_9 = arith.constant 0 : index
    %c0_10 = arith.constant 0 : index
    %18 = vector.load %arg8[%c0_9, %c0_10] : memref<8x160xf32, #tpu.memory_space<vmem>>, vector<8x160xf32>
    %19 = arith.mulf %17, %18 : vector<8x160xf32>
    %20 = vector.extract_strided_slice %19 {offsets = [0, 0], sizes = [8, 32], strides = [1, 1]} : vector<8x160xf32> to vector<8x32xf32>
    %21 = vector.extract_strided_slice %19 {offsets = [0, 32], sizes = [8, 32], strides = [1, 1]} : vector<8x160xf32> to vector<8x32xf32>
    %22 = arith.addf %20, %21 : vector<8x32xf32>
    %23 = vector.extract_strided_slice %19 {offsets = [0, 64], sizes = [8, 32], strides = [1, 1]} : vector<8x160xf32> to vector<8x32xf32>
    %24 = vector.extract_strided_slice %19 {offsets = [0, 96], sizes = [8, 32], strides = [1, 1]} : vector<8x160xf32> to vector<8x32xf32>
    %25 = arith.addf %23, %24 : vector<8x32xf32>
    %26 = vector.extract_strided_slice %19 {offsets = [0, 128], sizes = [8, 32], strides = [1, 1]} : vector<8x160xf32> to vector<8x32xf32>
    %27 = vector.shape_cast %22 : vector<8x32xf32> to vector<8x4x8xf32>
    %28 = tpu.transpose %27, [1, 0, 2] : vector<8x4x8xf32> -> vector<4x8x8xf32>
    %29 = vector.shape_cast %25 : vector<8x32xf32> to vector<8x4x8xf32>
    %30 = tpu.transpose %29, [1, 0, 2] : vector<8x4x8xf32> -> vector<4x8x8xf32>
    %31 = vector.shape_cast %26 : vector<8x32xf32> to vector<8x4x8xf32>
    %32 = tpu.transpose %31, [1, 0, 2] : vector<8x4x8xf32> -> vector<4x8x8xf32>
    %33 = arith.truncf %28 : vector<4x8x8xf32> to vector<4x8x8xbf16>
    %34 = arith.truncf %30 : vector<4x8x8xf32> to vector<4x8x8xbf16>
    "tpu.trace_start"() <{level = 10 : i32, message = "hnd,hmd->hnm"}> : () -> ()
    %cst_11 = arith.constant dense<0.000000e+00> : vector<4x8x8xf32>
    %35 = tpu.matmul %33, %34, %cst_11 {dimension_numbers = #tpu.dot_dimension_numbers<[2], [2], [1], [1], [0, 0, 0, 1, 1, 1], [0], [0]>} : vector<4x8x8xbf16>, vector<4x8x8xbf16>, vector<4x8x8xf32> -> vector<4x8x8xf32>
    "tpu.trace_stop"() : () -> ()
    %cst_12 = arith.constant dense<0xFF800000> : vector<4x8xf32>
    %36 = vector.multi_reduction <maximumf>, %35, %cst_12 [2] : vector<4x8x8xf32> to vector<4x8xf32>
    %37 = vector.shape_cast %36 : vector<4x8xf32> to vector<4x8x1xf32>
    %38 = vector.broadcast %37 : vector<4x8x1xf32> to vector<4x8x8xf32>
    %39 = arith.subf %35, %38 : vector<4x8x8xf32>
    %40 = math.exp %39 : vector<4x8x8xf32>
    %cst_13 = arith.constant dense<0.000000e+00> : vector<4x8xf32>
    %41 = vector.multi_reduction <add>, %40, %cst_13 [2] : vector<4x8x8xf32> to vector<4x8xf32>
    %42 = vector.shape_cast %41 : vector<4x8xf32> to vector<4x8x1xf32>
    %43 = tpu.reciprocal %42 {approx = true} : vector<4x8x1xf32> -> vector<4x8x1xf32>
    %44 = vector.broadcast %43 : vector<4x8x1xf32> to vector<4x8x8xf32>
    %45 = arith.mulf %40, %44 : vector<4x8x8xf32>
    %46 = arith.truncf %45 : vector<4x8x8xf32> to vector<4x8x8xbf16>
    %47 = arith.truncf %32 : vector<4x8x8xf32> to vector<4x8x8xbf16>
    "tpu.trace_start"() <{level = 10 : i32, message = "hnm,hmd->hnd"}> : () -> ()
    %cst_14 = arith.constant dense<0.000000e+00> : vector<4x8x8xf32>
    %48 = tpu.matmul %46, %47, %cst_14 {dimension_numbers = #tpu.dot_dimension_numbers<[2], [1], [1], [2], [0, 0, 0, 1, 1, 2], [0], [0]>} : vector<4x8x8xbf16>, vector<4x8x8xbf16>, vector<4x8x8xf32> -> vector<4x8x8xf32>
    "tpu.trace_stop"() : () -> ()
    %49 = arith.truncf %48 : vector<4x8x8xf32> to vector<4x8x8xbf16>
    %c0_15 = arith.constant 0 : index
    %c0_16 = arith.constant 0 : index
    %c0_17 = arith.constant 0 : index
    %50 = vector.load %arg3[%c0_15, %c0_16, %c0_17] : memref<4x8x32xbf16, #tpu.memory_space<vmem>>, vector<4x8x32xbf16>
    "tpu.trace_start"() <{level = 10 : i32, message = "hnd,hde->hne"}> : () -> ()
    %cst_18 = arith.constant dense<0.000000e+00> : vector<4x8x32xf32>
    %51 = tpu.matmul %49, %50, %cst_18 {dimension_numbers = #tpu.dot_dimension_numbers<[2], [1], [1], [2], [0, 0, 0, 1, 1, 2], [0], [0]>} : vector<4x8x8xbf16>, vector<4x8x32xbf16>, vector<4x8x32xf32> -> vector<4x8x32xf32>
    "tpu.trace_stop"() : () -> ()
    %cst_19 = arith.constant dense<0.000000e+00> : vector<8x32xf32>
    %52 = vector.multi_reduction <add>, %51, %cst_19 [0] : vector<4x8x32xf32> to vector<8x32xf32>
    %53 = arith.addf %1, %52 : vector<8x32xf32>
    %c0_20 = arith.constant 0 : index
    %c0_21 = arith.constant 0 : index
    %54 = vector.load %arg7[%c0_20, %c0_21] : memref<1x32xf32, #tpu.memory_space<vmem>>, vector<1x32xf32>
    %55 = arith.mulf %53, %53 : vector<8x32xf32>
    %cst_22 = arith.constant dense<0.000000e+00> : vector<8xf32>
    %56 = vector.multi_reduction <add>, %55, %cst_22 [1] : vector<8x32xf32> to vector<8xf32>
    %57 = vector.shape_cast %56 : vector<8xf32> to vector<8x1xf32>
    %cst_23 = arith.constant 3.200000e+01 : f32
    %58 = vector.broadcast %cst_23 : f32 to vector<8x1xf32>
    %59 = arith.divf %57, %58 : vector<8x1xf32>
    %cst_24 = arith.constant 9.99999997E-7 : f32
    %60 = vector.broadcast %cst_24 : f32 to vector<8x1xf32>
    %61 = arith.addf %59, %60 : vector<8x1xf32>
    %62 = math.rsqrt %61 : vector<8x1xf32>
    %63 = vector.broadcast %62 : vector<8x1xf32> to vector<8x32xf32>
    %64 = arith.mulf %53, %63 : vector<8x32xf32>
    %65 = vector.broadcast %54 : vector<1x32xf32> to vector<8x32xf32>
    %66 = arith.mulf %65, %64 : vector<8x32xf32>
    %c0_25 = arith.constant 0 : index
    %c0_26 = arith.constant 0 : index
    %67 = vector.load %arg4[%c0_25, %c0_26] : memref<32x128xbf16, #tpu.memory_space<vmem>>, vector<32x128xbf16>
    %68 = arith.truncf %66 : vector<8x32xf32> to vector<8x32xbf16>
    %cst_27 = arith.constant dense<0.000000e+00> : vector<8x128xf32>
    %69 = tpu.matmul %68, %67, %cst_27 {dimension_numbers = #tpu.dot_dimension_numbers<[1], [0], [0], [1], [0, 0, 1, 1], [], []>} : vector<8x32xbf16>, vector<32x128xbf16>, vector<8x128xf32> -> vector<8x128xf32>
    %70 = vector.extract_strided_slice %69 {offsets = [0, 0], sizes = [8, 64], strides = [1, 1]} : vector<8x128xf32> to vector<8x64xf32>
    %71 = vector.extract_strided_slice %69 {offsets = [0, 64], sizes = [8, 64], strides = [1, 1]} : vector<8x128xf32> to vector<8x64xf32>
    %72 = arith.negf %71 : vector<8x64xf32>
    %73 = math.exp %72 : vector<8x64xf32>
    %cst_28 = arith.constant 1.000000e+00 : f32
    %74 = vector.broadcast %cst_28 : f32 to vector<8x64xf32>
    %75 = arith.addf %74, %73 : vector<8x64xf32>
    %76 = arith.divf %74, %75 : vector<8x64xf32>
    %77 = arith.mulf %71, %76 : vector<8x64xf32>
    %78 = arith.mulf %70, %77 : vector<8x64xf32>
    %c0_29 = arith.constant 0 : index
    %c0_30 = arith.constant 0 : index
    %79 = vector.load %arg5[%c0_29, %c0_30] : memref<64x32xbf16, #tpu.memory_space<vmem>>, vector<64x32xbf16>
    %80 = arith.truncf %78 : vector<8x64xf32> to vector<8x64xbf16>
    %cst_31 = arith.constant dense<0.000000e+00> : vector<8x32xf32>
    %81 = tpu.matmul %80, %79, %cst_31 {dimension_numbers = #tpu.dot_dimension_numbers<[1], [0], [0], [1], [0, 0, 1, 1], [], []>} : vector<8x64xbf16>, vector<64x32xbf16>, vector<8x32xf32> -> vector<8x32xf32>
    %82 = arith.addf %53, %81 : vector<8x32xf32>
    %c0_32 = arith.constant 0 : index
    %c0_33 = arith.constant 0 : index
    %c0_34 = arith.constant 0 : index
    %83 = vector.load %arg9[%c0_32, %c0_33, %c0_34] : memref<1x8x32xf32, #tpu.memory_space<vmem>>, vector<1x8x32xf32>
    %84 = vector.shape_cast %83 : vector<1x8x32xf32> to vector<8x32xf32>
    %85 = vector.shape_cast %82 : vector<8x32xf32> to vector<1x8x32xf32>
    tpu.vector_store %arg9[%c0_32, %c0_33, %c0_34], %85 {strides = array<i32>} : memref<1x8x32xf32, #tpu.memory_space<vmem>>, vector<1x8x32xf32>,
    return
  }
  func.func @transform_0(%arg0: i32) -> (i32, i32, i32) {
    %c0_i32 = arith.constant 0 : i32
    %c0_i32_0 = arith.constant 0 : i32
    %c0_i32_1 = arith.constant 0 : i32
    return %arg0, %c0_i32, %c0_i32_0 : i32, i32, i32
  }
  func.func @transform_1(%arg0: i32) -> (i32, i32) {
    %c0_i32 = arith.constant 0 : i32
    %c0_i32_0 = arith.constant 0 : i32
    %c0_i32_1 = arith.constant 0 : i32
    return %c0_i32, %c0_i32_0 : i32, i32
  }
  func.func @transform_2(%arg0: i32) -> (i32, i32, i32) {
    %c0_i32 = arith.constant 0 : i32
    %c0_i32_0 = arith.constant 0 : i32
    %c0_i32_1 = arith.constant 0 : i32
    %c0_i32_2 = arith.constant 0 : i32
    return %c0_i32, %c0_i32_0, %c0_i32_1 : i32, i32, i32
  }
  func.func @transform_3(%arg0: i32) -> (i32, i32) {
    %c0_i32 = arith.constant 0 : i32
    %c0_i32_0 = arith.constant 0 : i32
    %c0_i32_1 = arith.constant 0 : i32
    return %c0_i32, %c0_i32_0 : i32, i32
  }
  func.func @transform_4(%arg0: i32) -> (i32, i32) {
    %c0_i32 = arith.constant 0 : i32
    %c0_i32_0 = arith.constant 0 : i32
    %c0_i32_1 = arith.constant 0 : i32
    return %c0_i32, %c0_i32_0 : i32, i32
  }
  func.func @transform_5(%arg0: i32) -> (i32, i32) {
    %c0_i32 = arith.constant 0 : i32
    %c0_i32_0 = arith.constant 0 : i32
    %c0_i32_1 = arith.constant 0 : i32
    return %c0_i32, %c0_i32_0 : i32, i32
  }
  func.func @transform_6(%arg0: i32) -> (i32, i32) {
    %c0_i32 = arith.constant 0 : i32
    %c0_i32_0 = arith.constant 0 : i32
    %c0_i32_1 = arith.constant 0 : i32
    return %c0_i32, %c0_i32_0 : i32, i32
  }
  func.func @transform_7(%arg0: i32) -> (i32, i32) {
    %c0_i32 = arith.constant 0 : i32
    %c0_i32_0 = arith.constant 0 : i32
    %c0_i32_1 = arith.constant 0 : i32
    return %c0_i32, %c0_i32_0 : i32, i32
  }
  func.func @transform_8(%arg0: i32) -> (i32, i32, i32) {
    %c0_i32 = arith.constant 0 : i32
    %c0_i32_0 = arith.constant 0 : i32
    %c0_i32_1 = arith.constant 0 : i32
    return %arg0, %c0_i32, %c0_i32_0 : i32, i32, i32
  }
}

</mosaic_0001>

<bundles_post_ra>
// kernel: tpu_custom_call.1
= control target key start
LH: loop header
LB: loop body
LE: loop exit
PB: predicated region body
PF: predicated region fallthrough
CT: control target
= control target key end

     0   :  { %13 = vsyncpa [#allocation3], 0  ;;  %s2620_s0 = inlined_call_operand.vmem [shape: f32[2,8,32], index: 0, kind: input, shape index: {}]   ;;  %s2621_s1 = inlined_call_operand.vmem [shape: bf16[32,160], index: 1, kind: input, shape index: {}]   ;;  %s2622_s2 = inlined_call_operand.hbm [shape: bf16[4,8,32], index: 2, kind: input, shape index: {}]   ;;  %s2623_s3 = inlined_call_operand.hbm [shape: bf16[32,128], index: 3, kind: input, shape index: {}]   ;;  %s2624_s4 = inlined_call_operand.vmem [shape: bf16[64,32], index: 4, kind: input, shape index: {}]   ;;  %s2625_s5 = inlined_call_operand.vmem [shape: f32[1,32], index: 5, kind: input, shape index: {}]   ;;  %s2626_s6 = inlined_call_operand.vmem [shape: f32[1,32], index: 6, kind: input, shape index: {}]   ;;  %s2627_s7 = inlined_call_operand.vmem [shape: f32[8,160], index: 7, kind: input, shape index: {}]   ;;  %s2628_s8 = inlined_call_operand.hbm [shape: f32[2,8,32], index: 8, kind: output, shape index: {}]  }
   0x1   :  { %14 = vsyncpa [#allocation6], 0 }
   0x2   :  { %15 = vsyncpa [#allocation4], 0 }
   0x3   :  { %17 = vsyncpa [#allocation4 + $0x1], 0  ;;  %s2229_s27 = smov 0   ;;  %s2231_s28 = smov 0  }
   0x4   :  { %s2233_s29 = smov 0   ;;  %s2235_s30 = smov 0  }
   0x5 LB: > { %2633 = sst [smem:[#allocation11_spill]] %s2163_s29  ;;  %s2250_s9 = sadd.s32 4294967295, %s2167_s30   ;;  %s2167_s30 = sphi %s2235_s30, %s2650_s30   ;;  %s2163_s29 = sphi %s2233_s29, %s2647_s29   ;;  %s2159_s28 = sphi %s2231_s28, %s2649_s28   ;;  %s2155_s27 = sphi %s2229_s27, %s2648_s27  }
   0x6   : > { %s1761_s10 = sadd.s32 4294967294, %s2167_s30   ;;  %s2254_s11 = sadd.s32 1, %s2167_s30  }
   0x7   : > { %s203_s12 = sadd.s32 1, %s2163_s29  ;;  %s200_s13 = ssub.s32 %s2167_s30, %s2254_s11 }
   0x8   : > { %p213_p0 = scmp.ne.s32.totalorder %s2163_s29, %s2159_s28  ;;  %p201_p1 = scmp.eq.s32.totalorder %s200_s13, 0 }
   0x9   : > { %p214_p2 = scmp.eq.s32.totalorder %s2250_s9, 1  ;;  %p219_p3 = scmp.ne.s32.totalorder %s2159_s28, %s2155_s27 }
   0xa   : > { %p220_p4 = scmp.eq.s32.totalorder %s1761_s10, 1  ;;  %p1762_p7 = scmp.ge.s32.totalorder %s2167_s30, 1 }
   0xb   : > { %s2265_s14 = scalar_select %p201_p1, %s2163_s29, %s203_s12  }
   0xc   : > { %p2267_p5 = por %p214_p2, %p213_p0  ;;  %p2271_p6 = por %p220_p4, %p219_p3 }
   0xd   : > { %2634 = sst [smem:[#allocation12_spill]] %s2265_s14  ;;  %p227_p8 = scmp.lt.s32.totalorder %s2167_s30, 3 }
   0xe   : > { %s2635_s15 = scalar_select %p2267_p5, 1, 0 }
   0xf   : > { %s2636_s16 = scalar_select %p2271_p6, 1, 0 }
  0x10   : > { %p2629_p9 = scmp.eq.s32.totalorder %s2250_s9, 0  ;;  %p2278_p10 = pnand %p1762_p7, %p227_p8 }
  0x11   : > { %s2169_s18 = smov [#allocation2]   ;;  %s2170_s21 = smov [#allocation5]  }
  0x12   : > { %s2637_s17 = scalar_select %p2278_p10, 1, 0 }
  0x13   : > { %s242_s19 = sshll.u32 %s2169_s18, 4  ;;  %p1943_p11 = pneg %p2278_p10  ;;  %s243_s19 = int_to_ptr.vmem [resolvable:$true] %s242_s19 }
  0x14   : > { %s255_s22 = sshll.u32 %s2170_s21, 4  ;;  %s2041_s25 = scalar_lea.hbm %s2622_s2, 256  ;;  %s2290_s22 = int_to_ptr.vmem [resolvable:$true] %s255_s22 }
  0x15   : > { %p2286_p12 = pnand %p2629_p9, %p1943_p11  ;;  %p2042_p13 = scmp.ne.s32.totalorder %s2622_s2, %s2041_s25 }
  0x16   : > { %p2048_p3 = scmp.lt.u32.totalorder %s2041_s25, %s2622_s2 }
  0x17   : > { %p2043_p0 = pneg %p2286_p12 }
  0x19   : > { %p2044_p1 = pnand %p2043_p0, %p2042_p13 }
  0x1b   : > { %p2045_p2 = pneg %p2044_p1 }
  0x1d   : > { %p2050_p4 = pnand %p2048_p3, %p2045_p2 }
  0x1f   : > { %2053 = shalt.err (!%p2050_p4)
}
  0x20   : > { %s2054_s18 = scalar_lea.vmem %s243_s19, 256  ;;  %p2062_p9 = scmp.lt.s32.totalorder %s243_s19, %s243_s19 }
  0x21   : > { %p2055_p7 = scmp.ne.s32.totalorder %s243_s19, %s2054_s18  ;;  %p2063_p6 = scmp.lt.s32.totalorder %s2054_s18, %s2054_s18 }
  0x23   : > { %p2057_p8 = pnand %p2055_p7, %p2043_p0  ;;  %p2064_p5 = por %p2063_p6, %p2062_p9 }
  0x25   : > { %p2058_p11 = pneg %p2057_p8 }
  0x27   : > { %p2065_p10 = pnand %p2064_p5, %p2058_p11 }
  0x29   : > { %2068 = shalt.err (!%p2065_p10)
}
  0x2a   : > { %s2171_s21 = smov 64   ;;  %s2172_s23 = smov 4  }
  0x2b   : > { %1946 = dma.hbm_to_vmem [thread:$0]  (!%p2286_p12), %s2622_s2, 256, %s243_s19, [#allocation3], %s2171_s21, %s2171_s21, %s2172_s23  }
  0x2c   : > { %s2069_s12 = scalar_lea.hbm %s2623_s3, 256 }
  0x2d   : > { %p2070_p13 = scmp.ne.s32.totalorder %s2623_s3, %s2069_s12  ;;  %p2076_p9 = scmp.lt.u32.totalorder %s2069_s12, %s2623_s3 }
  0x2f   : > { %p2072_p5 = pnand %p2070_p13, %p2043_p0 }
  0x31   : > { %p2073_p6 = pneg %p2072_p5 }
  0x33   : > { %p2078_p10 = pnand %p2076_p9, %p2073_p6 }
  0x35   : > { %2081 = shalt.err (!%p2078_p10)
}
  0x36   : > { %s2082_s19 = scalar_lea.vmem %s2290_s22, 256  ;;  %p2090_p4 = scmp.lt.s32.totalorder %s2290_s22, %s2290_s22 }
  0x37   : > { %p2083_p1 = scmp.ne.s32.totalorder %s2290_s22, %s2082_s19  ;;  %p2091_p7 = scmp.lt.s32.totalorder %s2082_s19, %s2082_s19 }
  0x39   : > { %p2085_p2 = pnand %p2083_p1, %p2043_p0  ;;  %p2092_p8 = por %p2091_p7, %p2090_p4 }
  0x3b   : > { %p2086_p3 = pneg %p2085_p2 }
  0x3d   : > { %p2093_p11 = pnand %p2092_p8, %p2086_p3 }
  0x3f   : > { %2096 = shalt.err (!%p2093_p11)
}
  0x40   : > { %1949 = dma.hbm_to_vmem [thread:$0]  (!%p2286_p12), %s2623_s3, 256, %s2290_s22, [#allocation6], %s2171_s21, %s2171_s21, %s2172_s23  }
  0x41   : > { %p2639_p13 = scmp.ne.s32.totalorder %s2637_s17, 0 }
  0x42   : > { %p2640_p5 = scmp.eq.s32.totalorder (!%p2639_p13), %s2250_s9, 0 }
  0x43   : > { %290 = sbr.rel (%p2639_p13) target bundleno = 2617 (0xa39), region = 52 }
  0x4a   : > { %2142 = dma.done.wait (%p2640_p5), [#allocation3], 256   ;;  %p2641_p0 = pmov %p2640_p5 }
  0x4c   : > { %2144 = vsyncadd (%p2641_p0), [#allocation3], 4294967040  ;;  %p2642_p6 = pmov %p2641_p0 }
  0x4d   : > { %p2643_p9 = pmov %p2641_p0 }
  0x4e   : > { %2146 = dma.done.wait (%p2642_p6), [#allocation6], 256  }
  0x4f   : > { %2148 = vsyncadd (%p2643_p9), [#allocation6], 4294967040  ;;  %p327_p10 = scmp.lt.s32.totalorder %s2250_s9, 1  ;;  %vm335_vm0 = vcmask 261120   ;;  %v2005_v3 = vld [vmem:[%s2621_s1 + $0x4] ss:$8 sps:$4 sm:$0xff]   ;;  %v444_v26 = vlaneseq }
  0x50   : > { %v2007_v4 = vld [vmem:[%s2621_s1] ss:$8 sps:$4 sm:$0xff]   ;;  %v2008_v5 = vld [vmem:[%s2621_s1 + $0x14] ss:$8 sps:$4 sm:$0xff]   ;;  %379 = vmatprep.subr.bf16.mxu1 %v2005_v3  ;;  %v2173_v6 = vmov 0   ;;  %s2174_s21 = smov 96  }
  0x51   : > { %s328_s20 = scalar_select %p327_p10, %s2250_s9, 1  ;;  %411 = vmatprep.mubr.bf16.mxu1 %v2173_v6  ;;  %380 = vmatpush1.bf16.msra.mxu1 %v2007_v4  ;;  %v2010_v7 = vld [vmem:[%s2621_s1 + $0x10] ss:$8 sps:$4 sm:$0xff]   ;;  %v1771_v12 = vld [vmem:[%s2625_s5] ss:$0 sm:$0xff]  ;;  %v445_v31 = vshrl.u32 %v444_v26, 7 }
  0x52   : > { %381 = vmatprep.subr.bf16.mxu1 %v2008_v5  ;;  %v420_v16 = vld [vmem:[%s2627_s7] sm:$0xff]  ;;  %s2175_s17 = smov 120   ;;  %s2177_s24 = smov 104   ;;  %v2179_v24 = vmov 1983009808   ;;  %v2181_v37 = vmov 0.0  }
  0x53   : > { %s1770_s22 = sshll.u32 %s328_s20, 3  ;;  %s2178_s25 = smov 64   ;;  %v442_v25 = vunpack.c.l.s4 %v2179_v24  ;;  %v2180_v28 = vmov 1934713408   ;;  %1847 = vmatprep.subr.bf16.mxu0 %v2181_v37  ;;  %vm2182_vm1 = vmmov 0   ;;  %vm877_vm2 = vcmask 64512  }
  0x54   : > { %s330_s23 = scalar_lea.vmem %s2620_s0, %s1770_s22  ;;  %v474_v29 = vunpack.c.l.s4 %v2180_v28  ;;  %1849 = vmatprep.mubr.msk.bf16.mxu0 %vm2182_vm1, %v2181_v37  ;;  %vm1117_vm3 = vcmask 1043456   ;;  %vm1620_vm4 = vcmask 523264   ;;  %s1806_s26 = sshll.u32 %s2250_s9, 7 }
  0x55   : > { %v2354_v0 = vld [vmem:[%s330_s23] sm:$0xff]  ;;  %382 = vmatpush1.bf16.msra.mxu1 %v2010_v7  ;;  %s2176_s23 = smov 112   ;;  %v443_v30 = vunpack.c.0.s8 %v442_v25  ;;  %s2577_s19 = scalar_lea.hbm %s2628_s8, %s1806_s26 }
  0x56   : > { %v334_v1 = vmul.f32 %v2354_v0, %v2354_v0  ;;  %v475_v33 = vunpack.c.0.s8 %v474_v29  ;;  %1841 = vmatprep.subr.bf16.mxu1 %v2181_v37  ;;  %p2644_p1 = scmp.ne.s32.totalorder %s2635_s15, 0  ;;  %s2183_s29 = smov [#allocation7]  }
  0x57   : > { %v2387_v34 = vsub.s32 %v443_v30, %v445_v31  ;;  %s2101_s14 = sshll.u32 %s2183_s29, 4  ;;  %s2102_s14 = int_to_ptr.vmem [resolvable:$false] %s2101_s14 }
  0x58   : > { %v336_v2 = vsel %vm335_vm0, %v334_v1, 0.0  ;;  %v2392_v41 = vsub.s32 %v475_v33, %v445_v31  ;;  %s2103_s20 = scalar_lea.vmem %s2102_s14, 256 }
  0x59   : > { %337 = vadd.xlane.f32.xlu0 %v336_v2 }
  0xe6   : > { %v338_v8 = vpop.xlane.xlu0 %337 }
  0xe7   : > { %v340_v9 = vmul.f32 0.03125, %v338_v8 }
  0xe9   : > { %v341_v10 = vadd.f32 1e-06, %v340_v9 }
  0xeb   : > { %2017 = vrsqrt.f32 %v341_v10 }
  0xf5   : > { %v2018_v11 = vpop.eup %2017 }
  0xf6   : > { %v343_v13 = vmul.f32 %v2018_v11, %v2354_v0 }
  0xf8   : > { %v350_v14 = vmul.f32 %v1771_v12, %v343_v13 }
  0xfa   : > { %v355_v15 = vpack.c.bf16 %v350_v14, %v350_v14 }
  0xfc   : > { %1776 = vmatmul.mubr.msk.bf16.vlgmr.msra.gmra.mrb[0].mxu1 %vm335_vm0, %v355_v15 }
  0xfd   : > { %1843 = vmatprep.mubr.msk.bf16.mxu1 %vm2182_vm1, %v2181_v37 }
 0x1cf   : > { %v413_v17 = vpop.f32.mrb[0].mxu1 }
 0x1d0   : > { %v422_v18 = vmul.f32 %v420_v16, %v413_v17  ;;  %v2379_v19 = vpop.f32.mrb[1].mxu1 }
 0x1d1   : > { %v417_v20 = vpop.f32.mrb[2].mxu1 }
 0x1d2   : > { %425 = vrot.lane.b32.xlu0 %v422_v18, %s2174_s21  ;;  %v418_v21 = vpop.f32.mrb[3].mxu1 }
 0x244   : > { %v426_v22 = vpop.permute.xlu0 %425 }
 0x245   : > { %v428_v23 = vadd.f32 %v426_v22, %v422_v18 }
 0x247   : > { %430 = vrot.lane.b32.xlu1 %v428_v23, %s2175_s17 }
 0x24b   : > { %433 = vrot.lane.b32.xlu1 %v428_v23, %s2176_s23 }
 0x24f   : > { %436 = vrot.lane.b32.xlu1 %v428_v23, %s2177_s24 }
 0x253   : > { %575 = vrot.lane.b32.xlu1 %v428_v23, %s2178_s25 }
 0x2b9   : > { %v431_v27 = vpop.permute.xlu1 %430 }
 0x2ba   : > { %577 = vrot.lane.b32.xlu1 %v431_v27, %s2178_s25 }
 0x2bd   : > { %v434_v32 = vpop.permute.xlu1 %433 }
 0x2be   : > { %579 = vrot.lane.b32.xlu1 %v434_v32, %s2178_s25  ;;  %v439_v35 = vcombine.low %v428_v23, %v434_v32  ;;  %v440_v36 = vcombine.high %v428_v23, %v434_v32 }
 0x2c0   : > { %v447_v42 = vrot.slane %v439_v35, %v2387_v34  ;;  %v454_v43 = vrot.slane %v440_v36, %v2387_v34 }
 0x2c1   : > { %v437_v38 = vpop.permute.xlu1 %436 }
 0x2c2   : > { %v455_v39 = vcombine.low %v431_v27, %v437_v38  ;;  %v456_v40 = vcombine.high %v431_v27, %v437_v38  ;;  %581 = vrot.lane.b32.xlu1 %v437_v38, %s2178_s25 }
 0x2c4   : > { %v463_v44 = vrot.slane %v455_v39, %v2387_v34  ;;  %v470_v45 = vrot.slane %v456_v40, %v2387_v34 }
 0x2c5   : > { %v576_v11 = vpop.permute.xlu1 %575 }
 0x2c6   : > { %v471_v46 = vcombine.low %v447_v42, %v463_v44  ;;  %v472_v47 = vcombine.high %v447_v42, %v463_v44  ;;  %v487_v48 = vcombine.low %v454_v43, %v470_v45  ;;  %v488_v49 = vcombine.high %v454_v43, %v470_v45 }
 0x2c8   : > { %v479_v50 = vrot.slane %v471_v46, %v2392_v41  ;;  %v486_v51 = vrot.slane %v472_v47, %v2392_v41  ;;  %v495_v52 = vrot.slane %v487_v48, %v2392_v41  ;;  %v502_v53 = vrot.slane %v488_v49, %v2392_v41 }
 0x2ca   : > { %v507_v54 = vcombine.low %v479_v50, %v486_v51  ;;  %v1777_v55 = vcombine.high %v479_v50, %v486_v51  ;;  %v523_v56 = vcombine.low %v495_v52, %v502_v53  ;;  %v1778_v57 = vcombine.high %v495_v52, %v502_v53 }
 0x2cc   : > { %v514_v58 = vrot.slane %v507_v54, %v2387_v34  ;;  %v522_v59 = vrot.slane %v1777_v55, %v2387_v34  ;;  %v530_v60 = vrot.slane %v523_v56, %v2387_v34  ;;  %v538_v61 = vrot.slane %v1778_v57, %v2387_v34 }
 0x2ce   : > { %v539_v62 = vcombine.low %v514_v58, %v522_v59  ;;  %v540_v63 = vcombine.high %v514_v58, %v522_v59  ;;  %v555_v1 = vcombine.low %v530_v60, %v538_v61  ;;  %v556_v2 = vcombine.high %v530_v60, %v538_v61 }
 0x2d0   : > { %v547_v3 = vrot.slane %v539_v62, %v2392_v41  ;;  %v563_v4 = vrot.slane %v555_v1, %v2392_v41  ;;  %v554_v5 = vrot.slane %v540_v63, %v2392_v41  ;;  %v570_v6 = vrot.slane %v556_v2, %v2392_v41 }
 0x2d2   : > { %v571_v7 = vcombine.low %v547_v3, %v563_v4  ;;  %v572_v8 = vcombine.high %v547_v3, %v563_v4  ;;  %v2414_v9 = vcombine.low %v554_v5, %v570_v6  ;;  %v2416_v10 = vcombine.high %v554_v5, %v570_v6 }
 0x2d4   : > { %v869_v61 = vpack.c.bf16 %v571_v7, %v571_v7  ;;  %v870_v62 = vpack.c.bf16 %v572_v8, %v572_v8  ;;  %v871_v2 = vpack.c.bf16 %v2414_v9, %v2414_v9  ;;  %v872_v3 = vpack.c.bf16 %v2416_v10, %v2416_v10 }
 0x32c   : > { %v578_v12 = vpop.permute.xlu1 %577 }
 0x330   : > { %v580_v13 = vpop.permute.xlu1 %579 }
 0x331   : > { %v587_v14 = vcombine.low %v576_v11, %v580_v13  ;;  %v588_v15 = vcombine.high %v576_v11, %v580_v13 }
 0x333   : > { %v595_v20 = vrot.slane %v587_v14, %v2387_v34  ;;  %v602_v21 = vrot.slane %v588_v15, %v2387_v34 }
 0x334   : > { %v582_v16 = vpop.permute.xlu1 %581 }
 0x335   : > { %v603_v17 = vcombine.low %v578_v12, %v582_v16  ;;  %v604_v18 = vcombine.high %v578_v12, %v582_v16 }
 0x337   : > { %v611_v22 = vrot.slane %v603_v17, %v2387_v34  ;;  %v618_v23 = vrot.slane %v604_v18, %v2387_v34 }
 0x339   : > { %v619_v24 = vcombine.low %v595_v20, %v611_v22  ;;  %v620_v25 = vcombine.high %v595_v20, %v611_v22  ;;  %v635_v26 = vcombine.low %v602_v21, %v618_v23  ;;  %v636_v27 = vcombine.high %v602_v21, %v618_v23 }
 0x33b   : > { %v627_v28 = vrot.slane %v619_v24, %v2392_v41  ;;  %v634_v29 = vrot.slane %v620_v25, %v2392_v41  ;;  %v643_v30 = vrot.slane %v635_v26, %v2392_v41  ;;  %v650_v31 = vrot.slane %v636_v27, %v2392_v41  ;;  %v421_v25 = vld [vmem:[%s2627_s7 + $0x8] sm:$0xff] }
 0x33c   : > { %v423_v26 = vmul.f32 %v421_v25, %v2379_v19 }
 0x33d   : > { %v655_v32 = vcombine.low %v627_v28, %v634_v29  ;;  %v1779_v33 = vcombine.high %v627_v28, %v634_v29  ;;  %v671_v35 = vcombine.low %v643_v30, %v650_v31  ;;  %v1780_v36 = vcombine.high %v643_v30, %v650_v31 }
 0x33f   : > { %v662_v38 = vrot.slane %v655_v32, %v2387_v34  ;;  %v670_v39 = vrot.slane %v1779_v33, %v2387_v34  ;;  %v678_v40 = vrot.slane %v671_v35, %v2387_v34  ;;  %v686_v42 = vrot.slane %v1780_v36, %v2387_v34 }
 0x341   : > { %v687_v43 = vcombine.low %v662_v38, %v670_v39  ;;  %v703_v44 = vcombine.low %v678_v40, %v686_v42  ;;  %v688_v45 = vcombine.high %v662_v38, %v670_v39  ;;  %v704_v46 = vcombine.high %v678_v40, %v686_v42 }
 0x343   : > { %v695_v47 = vrot.slane %v687_v43, %v2392_v41  ;;  %v711_v48 = vrot.slane %v703_v44, %v2392_v41  ;;  %v702_v51 = vrot.slane %v688_v45, %v2392_v41  ;;  %v718_v52 = vrot.slane %v704_v46, %v2392_v41 }
 0x345   : > { %v719_v49 = vcombine.low %v695_v47, %v711_v48  ;;  %v720_v50 = vcombine.high %v695_v47, %v711_v48  ;;  %v721_v57 = vcombine.low %v702_v51, %v718_v52  ;;  %v722_v58 = vcombine.high %v702_v51, %v718_v52 }
 0x347   : > { %v873_v53 = vpack.c.bf16 %v719_v49, %v719_v49  ;;  %v874_v54 = vpack.c.bf16 %v720_v50, %v720_v50  ;;  %v875_v59 = vpack.c.bf16 %v721_v57, %v721_v57  ;;  %v876_v60 = vpack.c.bf16 %v722_v58, %v722_v58 }
 0x349   : > { %v882_v55 = vsel %vm877_vm2, %v873_v53, 0  ;;  %v928_v56 = vsel %vm877_vm2, %v874_v54, 0  ;;  %v974_v63 = vsel %vm877_vm2, %v875_v59, 0  ;;  %v1020_v1 = vsel %vm877_vm2, %v876_v60, 0 }
 0x34a   : > { %1842 = vmatpush3.bf16.xpose.msra.mxu1 %v882_v55  ;;  %1848 = vmatpush3.bf16.xpose.msra.mxu0 %v928_v56 }
 0x34b   : > { %1853 = vmatprep.subr.bf16.mxu1 %v2181_v37  ;;  %1859 = vmatprep.subr.bf16.mxu0 %v2181_v37 }
 0x351   : > { %1844 = vmatmul.mubr.msk.bf16.vlgmr.msra.gmra.mrb[4].mxu1 %vm877_vm2, %v869_v61  ;;  %1850 = vmatmul.mubr.msk.bf16.vlgmr.msra.gmra.mrb[0].mxu0 %vm877_vm2, %v870_v62 }
 0x352   : > { %1854 = vmatpush3.bf16.xpose.msra.mxu1 %v974_v63  ;;  %1860 = vmatpush3.bf16.xpose.msra.mxu0 %v1020_v1 }
 0x353   : > { %1855 = vmatprep.mubr.msk.bf16.mxu1 %vm2182_vm1, %v2181_v37  ;;  %1861 = vmatprep.mubr.msk.bf16.mxu0 %vm2182_vm1, %v2181_v37 }
 0x354   : > { %1865 = vmatprep.subr.bf16.mxu1 %v2181_v37  ;;  %1871 = vmatprep.subr.bf16.mxu0 %v2181_v37 }
 0x359   : > { %1856 = vmatmul.mubr.msk.bf16.vlgmr.msra.gmra.mrb[8].mxu1 %vm877_vm2, %v871_v2  ;;  %1862 = vmatmul.mubr.msk.bf16.vlgmr.msra.gmra.mrb[4].mxu0 %vm877_vm2, %v872_v3 }
 0x35a   : > { %1867 = vmatprep.mubr.msk.bf16.mxu1 %vm2182_vm1, %v2181_v37  ;;  %1873 = vmatprep.mubr.msk.bf16.mxu0 %vm2182_vm1, %v2181_v37 }
 0x424   : > { %v918_v4 = vpop.f32.mrb[4].mxu1  ;;  %v964_v5 = vpop.f32.mrb[0].mxu0 }
 0x425   : > { %v1845_v6 = vpop.f32.mrb[5].mxu1  ;;  %v1851_v7 = vpop.f32.mrb[1].mxu0  ;;  %v1065_v8 = vsel %vm877_vm2, %v964_v5, -inf  ;;  %v1062_v9 = vsel %vm877_vm2, %v918_v4, -inf }
 0x426   : > { %1066 = vmax.xlane.f32.xlu1 %v1065_v8  ;;  %v967_v10 = vpop.f32.mrb[2].mxu0  ;;  %1063 = vmax.xlane.f32.xlu0 %v1062_v9  ;;  %v921_v11 = vpop.f32.mrb[6].mxu1 }
 0x427   : > { %v1846_v12 = vpop.f32.mrb[7].mxu1  ;;  %v1852_v13 = vpop.f32.mrb[3].mxu0 }
 0x42c   : > { %v1010_v14 = vpop.f32.mrb[8].mxu1  ;;  %v1056_v15 = vpop.f32.mrb[4].mxu0 }
 0x42d   : > { %v1857_v16 = vpop.f32.mrb[9].mxu1  ;;  %v1863_v17 = vpop.f32.mrb[5].mxu0  ;;  %v1068_v18 = vsel %vm877_vm2, %v1010_v14, -inf  ;;  %v1071_v24 = vsel %vm877_vm2, %v1056_v15, -inf }
 0x42e   : > { %v1059_v20 = vpop.f32.mrb[6].mxu0  ;;  %1069 = vmax.xlane.f32.xlu0 %v1068_v18  ;;  %v1013_v21 = vpop.f32.mrb[10].mxu1 }
 0x42f   : > { %v1858_v22 = vpop.f32.mrb[11].mxu1  ;;  %v1864_v23 = vpop.f32.mrb[7].mxu0 }
 0x432   : > { %1072 = vmax.xlane.f32.xlu0 %v1071_v24 }
 0x437   : > { %724 = vrot.lane.b32.xlu1 %v423_v26, %s2175_s17 }
 0x4b3   : > { %v1067_v27 = vpop.xlane.xlu1 %1066  ;;  %v1064_v28 = vpop.xlane.xlu0 %1063 }
 0x4b4   : > { %v1075_v29 = vsub.f32 %v964_v5, %v1067_v27  ;;  %v1074_v30 = vsub.f32 %v918_v4, %v1064_v28 }
 0x4b6   : > { %v1080_v31 = vmul.f32 1.442695, %v1075_v29  ;;  %v1078_v32 = vmul.f32 1.442695, %v1074_v30 }
 0x4b7   : > { %v725_v49 = vpop.permute.xlu1 %724 }
 0x4b8   : > { %2019 = vpow2.f32 %v1080_v31 }
 0x4b9   : > { %2021 = vpow2.f32 %v1078_v32 }
 0x4bb   : > { %v1070_v38 = vpop.xlane.xlu0 %1069 }
 0x4bc   : > { %v1076_v42 = vsub.f32 %v1010_v14, %v1070_v38 }
 0x4be   : > { %v1082_v44 = vmul.f32 1.442695, %v1076_v42 }
 0x4bf   : > { %v1073_v39 = vpop.xlane.xlu0 %1072 }
 0x4c0   : > { %v1077_v40 = vsub.f32 %v1056_v15, %v1073_v39 }
 0x4c2   : > { %v2467_v33 = vpop.eup %2019  ;;  %v1084_v43 = vmul.f32 1.442695, %v1077_v40 }
 0x4c3   : > { %v2469_v35 = vpop.eup %2021  ;;  %v1089_v36 = vsel %vm877_vm2, %v2467_v33, 0.0 }
 0x4c4   : > { %v1086_v19 = vsel %vm877_vm2, %v2469_v35, 0.0  ;;  %1090 = vadd.xlane.f32.xlu0 %v1089_v36  ;;  %2023 = vpow2.f32 %v1084_v43 }
 0x4c5   : > { %1087 = vadd.xlane.f32.xlu1 %v1086_v19  ;;  %2025 = vpow2.f32 %v1082_v44 }
 0x4ce   : > { %v2477_v45 = vpop.eup %2023 }
 0x4cf   : > { %v2479_v46 = vpop.eup %2025  ;;  %v1095_v47 = vsel %vm877_vm2, %v2477_v45, 0.0 }
 0x4d0   : > { %v1092_v48 = vsel %vm877_vm2, %v2479_v46, 0.0 }
 0x4d6   : > { %730 = vrot.lane.b32.xlu1 %v423_v26, %s2177_s24 }
 0x4da   : > { %727 = vrot.lane.b32.xlu0 %v423_v26, %s2176_s23  ;;  %s324_s23 = sand.u32 1, %s2159_s28  }
 0x4db   : > { %s1769_s24 = sshll.u32 %s324_s23, 3  ;;  %s1667_s9 = scalar_lea.sflag [#allocation4], %s324_s23 }
 0x4dc   : > { %s326_s10 = scalar_lea.vmem [#allocation7], %s1769_s24 }
 0x4dd   : > { %s1680_s12 = sshll.u32 %s326_s10, 4  ;;  %s2579_s12 = int_to_ptr.vmem [resolvable:$true] %s1680_s12 }
 0x4de   : > { %p2104_p4 = scmp.lt.s32.totalorder %s2579_s12, %s2102_s14 }
 0x4f9   : > { %1096 = vadd.xlane.f32.xlu0 %v1095_v47 }
 0x4fa   : > { %1093 = vadd.xlane.f32.xlu1 %v1092_v48 }
 0x551   : > { %v1091_v50 = vpop.xlane.xlu0 %1090 }
 0x552   : > { %v1088_v51 = vpop.xlane.xlu1 %1087  ;;  %2027 = vrcp.f32 %v1091_v50 }
 0x553   : > { %2029 = vrcp.f32 %v1088_v51 }
 0x555   : > { %v728_v52 = vpop.permute.xlu0 %727 }
 0x556   : > { %v731_v53 = vpop.permute.xlu1 %730  ;;  %v733_v54 = vcombine.low %v423_v26, %v728_v52  ;;  %v734_v55 = vcombine.high %v423_v26, %v728_v52  ;;  %v1303_v52 = vld [vmem:[#allocation2] sm:$0xf] }
 0x557   : > { %v749_v56 = vcombine.low %v725_v49, %v731_v53  ;;  %v750_v57 = vcombine.high %v725_v49, %v731_v53  ;;  %v1304_v53 = vld [vmem:[#allocation2 + $0x4] sm:$0xf] }
 0x558   : > { %v741_v58 = vrot.slane %v733_v54, %v2387_v34  ;;  %v748_v59 = vrot.slane %v734_v55, %v2387_v34  ;;  %v1311_v54 = vsel %vm1117_vm3, %v1303_v52, 0  ;;  %v1306_v55 = vld [vmem:[#allocation2 + $0xc] sm:$0xf] }
 0x559   : > { %v757_v60 = vrot.slane %v749_v56, %v2387_v34  ;;  %v764_v61 = vrot.slane %v750_v57, %v2387_v34 }
 0x55b   : > { %v765_v62 = vcombine.low %v741_v58, %v757_v60  ;;  %v766_v63 = vcombine.high %v741_v58, %v757_v60  ;;  %v781_v1 = vcombine.low %v748_v59, %v764_v61  ;;  %v782_v2 = vcombine.high %v748_v59, %v764_v61 }
 0x55c   : > { %v2028_v22 = vpop.eup %2027 }
 0x55d   : > { %v773_v3 = vrot.slane %v765_v62, %v2392_v41  ;;  %v780_v4 = vrot.slane %v766_v63, %v2392_v41  ;;  %v789_v5 = vrot.slane %v781_v1, %v2392_v41  ;;  %v796_v6 = vrot.slane %v782_v2, %v2392_v41  ;;  %v2030_v25 = vpop.eup %2029 }
 0x55e   : > { %v1103_v30 = vmul.f32 %v2028_v22, %v2467_v33  ;;  %v1449_v63 = vsel %vm1117_vm3, %v1306_v55, 0 }
 0x55f   : > { %v801_v7 = vcombine.low %v773_v3, %v780_v4  ;;  %v1781_v8 = vcombine.high %v773_v3, %v780_v4  ;;  %v817_v9 = vcombine.low %v789_v5, %v796_v6  ;;  %v1782_v10 = vcombine.high %v789_v5, %v796_v6 }
 0x560   : > { %v1107_v40 = vpack.c.bf16 %v1103_v30, %v1103_v30 }
 0x561   : > { %v808_v11 = vrot.slane %v801_v7, %v2387_v34  ;;  %v816_v12 = vrot.slane %v1781_v8, %v2387_v34  ;;  %v824_v13 = vrot.slane %v817_v9, %v2387_v34  ;;  %v832_v14 = vrot.slane %v1782_v10, %v2387_v34 }
 0x562   : > { %v1102_v34 = vmul.f32 %v2030_v25, %v2469_v35 }
 0x563   : > { %v833_v15 = vcombine.low %v808_v11, %v816_v12  ;;  %v834_v16 = vcombine.high %v808_v11, %v816_v12  ;;  %v849_v17 = vcombine.low %v824_v13, %v832_v14  ;;  %v850_v18 = vcombine.high %v824_v13, %v832_v14 }
 0x565   : > { %v841_v20 = vrot.slane %v833_v15, %v2392_v41  ;;  %v848_v21 = vrot.slane %v834_v16, %v2392_v41  ;;  %v857_v23 = vrot.slane %v849_v17, %v2392_v41  ;;  %v864_v24 = vrot.slane %v850_v18, %v2392_v41 }
 0x566   : > { %v1106_v41 = vpack.c.bf16 %v1102_v34, %v1102_v34 }
 0x567   : > { %v865_v26 = vcombine.low %v841_v20, %v857_v23  ;;  %v866_v27 = vcombine.high %v841_v20, %v857_v23  ;;  %v867_v28 = vcombine.low %v848_v21, %v864_v24  ;;  %v868_v29 = vcombine.high %v848_v21, %v864_v24 }
 0x569   : > { %v1110_v31 = vpack.c.bf16 %v865_v26, %v865_v26  ;;  %v1111_v32 = vpack.c.bf16 %v866_v27, %v866_v27  ;;  %v1112_v38 = vpack.c.bf16 %v867_v28, %v867_v28  ;;  %v1113_v39 = vpack.c.bf16 %v868_v29, %v868_v29 }
 0x56b   : > { %v1119_v36 = vsel %vm1117_vm3, %v1110_v31, 0  ;;  %v1165_v19 = vsel %vm1117_vm3, %v1111_v32, 0  ;;  %v1211_v33 = vsel %vm1117_vm3, %v1112_v38, 0  ;;  %v1257_v35 = vsel %vm1117_vm3, %v1113_v39, 0 }
 0x56c   : > { %1866 = vmatpush3.bf16.msra.mxu1 %v1119_v36  ;;  %1872 = vmatpush3.bf16.msra.mxu0 %v1165_v19 }
 0x56d   : > { %1877 = vmatprep.subr.bf16.mxu1 %v2181_v37  ;;  %1883 = vmatprep.subr.bf16.mxu0 %v2181_v37 }
 0x56f   : > { %1868 = vmatmul.mubr.msk.bf16.vlgmr.msra.gmra.mrb[12].mxu1 %vm877_vm2, %v1106_v41  ;;  %1874 = vmatmul.mubr.msk.bf16.vlgmr.msra.gmra.mrb[8].mxu0 %vm877_vm2, %v1107_v40 }
 0x570   : > { %1878 = vmatpush3.bf16.msra.mxu1 %v1211_v33  ;;  %1884 = vmatpush3.bf16.msra.mxu0 %v1257_v35 }
 0x571   : > { %1879 = vmatprep.mubr.msk.bf16.mxu1 %vm2182_vm1, %v2181_v37  ;;  %1885 = vmatprep.mubr.msk.bf16.mxu0 %vm2182_vm1, %v2181_v37 }
 0x572   : > { %1889 = vmatprep.subr.bf16.mxu1 %v2181_v37  ;;  %1895 = vmatprep.subr.bf16.mxu0 %v2181_v37 }
 0x586   : > { %v1097_v42 = vpop.xlane.xlu0 %1096 }
 0x587   : > { %v1094_v43 = vpop.xlane.xlu1 %1093  ;;  %2031 = vrcp.f32 %v1097_v42  ;;  %v2011_v42 = vld [vmem:[#allocation5] sm:$0xff]  }
 0x588   : > { %2033 = vrcp.f32 %v1094_v43  ;;  %v2012_v43 = vld [vmem:[#allocation5 + $0x8] sm:$0xff]  }
 0x591   : > { %v2032_v44 = vpop.eup %2031 }
 0x592   : > { %v2034_v47 = vpop.eup %2033  ;;  %v1105_v48 = vmul.f32 %v2032_v44, %v2477_v45  ;;  %v1357_v45 = vsel %vm1117_vm3, %v1304_v53, 0  ;;  %v2013_v53 = vld [vmem:[%s2624_s4] sm:$0xff]  }
 0x593   : > { %v1104_v49 = vmul.f32 %v2034_v47, %v2479_v46  ;;  %v1305_v46 = vld [vmem:[#allocation2 + $0x8] sm:$0xf] }
 0x594   : > { %v1109_v50 = vpack.c.bf16 %v1105_v48, %v1105_v48  ;;  %v1403_v62 = vsel %vm1117_vm3, %v1305_v46, 0 }
 0x595   : > { %v1108_v51 = vpack.c.bf16 %v1104_v49, %v1104_v49 }
 0x596   : > { %1886 = vmatmul.mubr.msk.bf16.vlgmr.msra.gmra.mrb[12].mxu0 %vm877_vm2, %v1109_v50  ;;  %v1795_v50 = vld [vmem:[%s2626_s6] ss:$0 sm:$0xff] }
 0x597   : > { %1880 = vmatmul.mubr.msk.bf16.vlgmr.msra.gmra.mrb[16].mxu1 %vm877_vm2, %v1108_v51  ;;  %1897 = vmatprep.mubr.msk.bf16.mxu0 %vm2182_vm1, %v2181_v37 }
 0x598   : > { %1891 = vmatprep.mubr.msk.bf16.mxu1 %vm2182_vm1, %v2181_v37  ;;  %1890 = vmatpush3.bf16.msra.mxu1 %v1311_v54  ;;  %v2014_v54 = vld [vmem:[%s2624_s4 + $0x8] sm:$0xff]  }
 0x599   : > { %1896 = vmatpush3.bf16.msra.mxu0 %v1357_v45  ;;  %1901 = vmatprep.subr.bf16.mxu1 %v2181_v37  ;;  %v2015_v45 = vld [vmem:[%s2624_s4 + $0x10] sm:$0xff]  }
 0x59a   : > { %1907 = vmatprep.subr.bf16.mxu0 %v2181_v37 }
 0x642   : > { %v1155_v56 = vpop.f32.mrb[12].mxu1  ;;  %v1201_v57 = vpop.f32.mrb[8].mxu0 }
 0x643   : > { %v1299_v58 = vpack.c.bf16 %v1155_v56, %v1155_v56  ;;  %v1300_v59 = vpack.c.bf16 %v1201_v57, %v1201_v57  ;;  %v1869_v60 = vpop.f32.mrb[13].mxu1  ;;  %v1875_v61 = vpop.f32.mrb[9].mxu0 }
 0x644   : > { %v1158_v1 = vpop.f32.mrb[14].mxu1  ;;  %v1204_v2 = vpop.f32.mrb[10].mxu0  ;;  %v2016_v61 = vld [vmem:[%s2624_s4 + $0x18] sm:$0xff]  }
 0x645   : > { %v1870_v3 = vpop.f32.mrb[15].mxu1  ;;  %v1876_v4 = vpop.f32.mrb[11].mxu0  ;;  %1892 = vmatmul.mubr.msk.bf16.vlgmr.msra.gmra.mrb[20].mxu1 %vm877_vm2, %v1299_v58  ;;  %1898 = vmatmul.mubr.msk.bf16.vlgmr.msra.gmra.mrb[16].mxu0 %vm877_vm2, %v1300_v59 }
 0x646   : > { %1902 = vmatpush3.bf16.msra.mxu1 %v1403_v62  ;;  %1908 = vmatpush3.bf16.msra.mxu0 %v1449_v63 }
 0x647   : > { %1903 = vmatprep.mubr.msk.bf16.mxu1 %vm2182_vm1, %v2181_v37  ;;  %1909 = vmatprep.mubr.msk.bf16.mxu0 %vm2182_vm1, %v2181_v37 }
 0x648   : > { %1913 = vmatprep.subr.bf16.mxu1 %v2181_v37  ;;  %1921 = vmatprep.subr.bf16.mxu0 %v2181_v37 }
 0x669   : > { %v1293_v5 = vpop.f32.mrb[12].mxu0 }
 0x66a   : > { %v1247_v6 = vpop.f32.mrb[16].mxu1  ;;  %v1302_v7 = vpack.c.bf16 %v1293_v5, %v1293_v5  ;;  %v1887_v8 = vpop.f32.mrb[13].mxu0 }
 0x66b   : > { %v1301_v9 = vpack.c.bf16 %v1247_v6, %v1247_v6  ;;  %v1881_v10 = vpop.f32.mrb[17].mxu1  ;;  %v1296_v11 = vpop.f32.mrb[14].mxu0 }
 0x66c   : > { %v1250_v12 = vpop.f32.mrb[18].mxu1  ;;  %v1888_v13 = vpop.f32.mrb[15].mxu0  ;;  %1910 = vmatmul.mubr.msk.bf16.vlgmr.msra.gmra.mrb[20].mxu0 %vm877_vm2, %v1302_v7 }
 0x66d   : > { %v1882_v14 = vpop.f32.mrb[19].mxu1  ;;  %1904 = vmatmul.mubr.msk.bf16.vlgmr.msra.gmra.mrb[24].mxu1 %vm877_vm2, %v1301_v9  ;;  %1929 = vmatprep.mubr.msk.bf16.mxu0 %vm2182_vm1, %v2181_v37 }
 0x66e   : > { %1917 = vmatprep.mubr.msk.bf16.mxu1 %vm2182_vm1, %v2181_v37  ;;  %1914 = vmatpush3.bf16.msra.mxu1 %v2011_v42 }
 0x66f   : > { %1915 = vmatprep.subr.bf16.mxu1 %v2181_v37  ;;  %1922 = vmatpush3.bf16.msra.mxu0 %v2013_v53 }
 0x670   : > { %1923 = vmatprep.subr.bf16.mxu0 %v2181_v37 }
 0x672   : > { %1916 = vmatpush3.bf16.msra.mxu1 %v2012_v43 }
 0x673   : > { %1924 = vmatpush3.bf16.msra.mxu0 %v2014_v54 }
 0x674   : > { %1925 = vmatprep.subr.bf16.mxu0 %v2181_v37 }
 0x677   : > { %1926 = vmatpush3.bf16.msra.mxu0 %v2015_v45 }
 0x678   : > { %1927 = vmatprep.subr.bf16.mxu0 %v2181_v37 }
 0x67b   : > { %1928 = vmatpush3.bf16.msra.mxu0 %v2016_v61 }
 0x718   : > { %v1347_v15 = vpop.f32.mrb[20].mxu1  ;;  %v1393_v16 = vpop.f32.mrb[16].mxu0 }
 0x719   : > { %v1491_v17 = vsel %vm335_vm0, %v1347_v15, 0.0  ;;  %v1492_v18 = vsel %vm335_vm0, %v1393_v16, 0.0  ;;  %v1893_v20 = vpop.f32.mrb[21].mxu1  ;;  %v1899_v21 = vpop.f32.mrb[17].mxu0 }
 0x71a   : > { %v1493_v22 = vadd.f32 %v1492_v18, %v1491_v17  ;;  %v1350_v23 = vpop.f32.mrb[22].mxu1  ;;  %v1396_v24 = vpop.f32.mrb[18].mxu0 }
 0x71b   : > { %v1894_v25 = vpop.f32.mrb[23].mxu1  ;;  %v1900_v26 = vpop.f32.mrb[19].mxu0 }
 0x73f   : > { %v1485_v27 = vpop.f32.mrb[20].mxu0 }
 0x740   : > { %v1439_v28 = vpop.f32.mrb[24].mxu1  ;;  %v1911_v29 = vpop.f32.mrb[21].mxu0  ;;  %v1496_v38 = vsel %vm335_vm0, %v1485_v27, 0.0 }
 0x741   : > { %v1494_v34 = vsel %vm335_vm0, %v1439_v28, 0.0  ;;  %v1905_v30 = vpop.f32.mrb[25].mxu1  ;;  %v1488_v31 = vpop.f32.mrb[22].mxu0 }
 0x742   : > { %v1495_v32 = vadd.f32 %v1494_v34, %v1493_v22  ;;  %v1442_v36 = vpop.f32.mrb[26].mxu1  ;;  %v1912_v19 = vpop.f32.mrb[23].mxu0 }
 0x743   : > { %v1906_v39 = vpop.f32.mrb[27].mxu1 }
 0x744   : > { %v1497_v41 = vadd.f32 %v1496_v38, %v1495_v32 }
 0x746   : > { %v1498_v40 = vadd.f32 %v1497_v41, %v2354_v0 }
 0x748   : > { %v1500_v33 = vmul.f32 %v1498_v40, %v1498_v40 }
 0x74a   : > { %v1501_v35 = vsel %vm335_vm0, %v1500_v33, 0.0 }
 0x74b   : > { %1502 = vadd.xlane.f32.xlu0 %v1501_v35 }
 0x7d8   : > { %v1503_v44 = vpop.xlane.xlu0 %1502 }
 0x7d9   : > { %v1504_v47 = vmul.f32 0.03125, %v1503_v44 }
 0x7db   : > { %v1505_v48 = vadd.f32 1e-06, %v1504_v47 }
 0x7dd   : > { %2035 = vrsqrt.f32 %v1505_v48 }
 0x7e7   : > { %v2036_v49 = vpop.eup %2035 }
 0x7e8   : > { %v1507_v0 = vmul.f32 %v2036_v49, %v1498_v40 }
 0x7ea   : > { %v1514_v51 = vmul.f32 %v1795_v50, %v1507_v0 }
 0x7ec   : > { %v1519_v52 = vpack.c.bf16 %v1514_v51, %v1514_v51 }
 0x7ee   : > { %1918 = vmatmul.mubr.msk.bf16.vlgmr.msra.gmra.mrb[28].mxu1 %vm335_vm0, %v1519_v52 }
 0x8c1   : > { %v1569_v46 = vpop.f32.mrb[28].mxu1 }
 0x8c2   : > { %v1799_v55 = vmul.f32 -1.442695, %v1569_v46  ;;  %v1919_v56 = vpop.f32.mrb[29].mxu1 }
 0x8c3   : > { %v1572_v57 = vpop.f32.mrb[30].mxu1 }
 0x8c4   : > { %2037 = vpow2.f32 %v1799_v55  ;;  %v1920_v58 = vpop.f32.mrb[31].mxu1 }
 0x8ce   : > { %v2038_v59 = vpop.eup %2037 }
 0x8cf   : > { %v1578_v60 = vadd.f32 1.0, %v2038_v59 }
 0x8d1   : > { %2039 = vrcp.f32 %v1578_v60 }
 0x8db   : > { %v2040_v62 = vpop.eup %2039 }
 0x8dc   : > { %v1581_v63 = vmul.f32 %v2040_v62, %v1569_v46 }
 0x8de   : > { %1583 = vrot.lane.b32.xlu1 %v1581_v63, %s2178_s25  ;;  %s2097_s25 = scalar_lea.vmem %s2579_s12, 128 }
 0x8df   : > { %p2098_p12 = scmp.ne.s32.totalorder %s2579_s12, %s2097_s25  ;;  %p2105_p7 = scmp.lt.s32.totalorder %s2103_s20, %s2097_s25 }
 0x8e1   : > { %p2099_p2 = pnand %p2098_p12, %p2644_p1  ;;  %p2106_p8 = por %p2105_p7, %p2104_p4 }
 0x8e3   : > { %p2100_p3 = pneg %p2099_p2 }
 0x8e5   : > { %p2107_p11 = pnand %p2106_p8, %p2100_p3 }
 0x950   : > { %v1584_v37 = vpop.permute.xlu1 %1583 }
 0x951   : > { %v1586_v1 = vmul.f32 %v1584_v37, %v1569_v46 }
 0x953   : > { %v1595_v2 = vpack.c.bf16 %v1586_v1, %v1586_v1 }
 0x955   : > { %1930 = vmatmul.mubr.msk.bf16.vlgmr.msra.gmra.mrb[24].mxu0 %vm1620_vm4, %v1595_v2 }
 0xa28   : > { %v1658_v3 = vpop.f32.mrb[24].mxu0 }
 0xa29   : > { %v1664_v4 = vadd.f32 %v1658_v3, %v1498_v40  ;;  %v1931_v5 = vpop.f32.mrb[25].mxu0 }
 0xa2a   : > { %v1661_v6 = vpop.f32.mrb[26].mxu0 }
 0xa2b   : > { %v1932_v7 = vpop.f32.mrb[27].mxu0  ;;  %1665 = vst.msk [vmem:[%s326_s10] sm:$0xff] %vm335_vm0, %v1664_v4 }
 0xa2c   : > { %2110 = shalt.err (!%p2107_p11)
}
 0xa2d   : > { %s2111_s22 = scalar_lea.hbm %s2577_s19, 128  ;;  %s2115_s23 = scalar_lea.hbm %s2628_s8, 256 }
 0xa2e   : > { %p2112_p13 = scmp.ne.s32.totalorder %s2577_s19, %s2111_s22  ;;  %p2116_p6 = scmp.lt.u32.totalorder %s2577_s19, %s2628_s8 }
 0xa2f   : > { %p2117_p9 = scmp.lt.u32.totalorder %s2115_s23, %s2111_s22  ;;  %p2119_p12 = scmp.lt.u32.totalorder %s2111_s22, %s2577_s19 }
 0xa30   : > { %p2113_p5 = pnand %p2112_p13, %p2644_p1 }
 0xa31   : > { %p2118_p10 = por %p2117_p9, %p2116_p6 }
 0xa32   : > { %p2114_p0 = pneg %p2113_p5 }
 0xa33   : > { %p2120_p2 = por %p2119_p12, %p2118_p10 }
 0xa35   : > { %p2121_p3 = pnand %p2120_p2, %p2114_p0 }
 0xa37   : > { %2124 = shalt.err (!%p2121_p3)
}
 0xa38   : > { %1941 = dma.vmem_to_hbm [thread:$0]  (%p2644_p1), %s2579_s12, 128, %s2577_s19, %s1667_s9  }
 0xa39 PF: > { %p1958_p4 = scmp.ge.s32.totalorder %s2167_s30, 2  ;;  %s1692_s10 = sand.u32 1, %s2155_s27  }
 0xa3a   : > { %p2645_p7 = scmp.ne.s32.totalorder %s2636_s16, 0  ;;  %s1693_s13 = scalar_lea.sflag [#allocation4], %s1692_s10 }
 0xa3c   : > { %p1951_p8 = pnand %p1958_p4, %p2645_p7 }
 0xa3e   : > { %2150 = dma.done.wait (!%p1951_p8), %s1693_s13, 128  }
 0xa3f   : > { %2152 = vsyncadd (!%p1951_p8), %s1693_s13, 4294967168  ;;  %s2646_s18 = sld [smem:[#allocation11_spill]]  ;;  %s2647_s29 = sld [smem:[#allocation12_spill]] }
 0xa40   : > { %p20_p11 = scmp.ge.s32.totalorder %s2254_s11, 4   ;;  %s2648_s27 = smov %s2159_s28 }
 0xa41   : > { %s2650_s30 = smov %s2254_s11 }
 0xa42   :  { %22 = sbr.rel (!%p20_p11) target bundleno = 5 (0x5), region = 96 }
 0xa45   : > { %s2649_s28 = smov %s2646_s18 }
 0xa49   :  { %1698 = vsyncpa [#allocation3], 1 }
 0xa4a   :  { %1700 = vsyncpa [#allocation3 + $0x1], 1 }
 0xa4b   :  { %1701 = vsyncpa [#allocation6], 1 }
 0xa4c   :  { %1702 = vsyncpa [#allocation4], 1 }
 0xa4d   :  { %1704 = vsyncpa [#allocation4 + $0x1], 1 }

</bundles_post_ra>
